<compile_context>
chip_gen: v7x
topology: tpu7x:2x2x1
jax: 0.10.0
libtpu: 0.0.40
codegen_flags: <defaults>
</compile_context>

<pallas_src>
import functools

import jax
import jax.numpy as jnp
from jax.experimental import pallas as pl
from jax.experimental.pallas import tpu as pltpu

_LANE = 128      # vreg lane width  (last dim)
_SUBLANE = 8     # vreg sublane width (second-to-last dim)


def _round_up(v: int, m: int) -> int:
    return ((v + m - 1) // m) * m


def _vmem_capacity_bytes() -> int:
    """Generation-aware VMEM size (v5e/v6e: 128 MiB, v7x: 64 MiB per TensorCore)."""
    try:
        info = pltpu.get_tpu_info()
        for name in ("vmem_capacity_bytes", "vmem_size_bytes", "vmem_bytes"):
            cap = getattr(info, name, None)
            if cap:
                return int(cap)
    except Exception:
        pass
    return 64 * 1024 * 1024   # conservative fallback = v7x per-TC VMEM


def _pick_col_tile(n_pad: int, max_cols: int) -> int:
    """Largest multiple of 128 that divides n_pad and is <= max_cols (floor 128)."""
    tc = max(_LANE, (max_cols // _LANE) * _LANE)
    tc = min(tc, n_pad)
    while n_pad % tc:
        tc -= _LANE
    return max(tc, _LANE)


# ----------------------------------------------------------------------------------
# Resident-L kernel: no grid, single VMEM buffer per operand, recurrence + theta
# contraction fused in one invocation.  out (C_out_pad, N_pad) is already (C_out, N).
# ----------------------------------------------------------------------------------
def _resident_kernel(K, *refs):
    if K > 1:
        lt_ref, x_ref, theta_ref, bias_ref, out_ref = refs
    else:
        x_ref, theta_ref, bias_ref, out_ref = refs

    t_prev = x_ref[...]                                                   # T_0^T (C_in, N)
    acc = jnp.dot(theta_ref[0], t_prev, preferred_element_type=jnp.float32)
    if K > 1:
        lt = lt_ref[...]                                                  # L^T (N, N)
        t_cur = jnp.dot(t_prev.astype(lt.dtype), lt,
                        preferred_element_type=jnp.float32)               # T_1^T
        acc = acc + jnp.dot(theta_ref[1], t_cur, preferred_element_type=jnp.float32)
        for k in range(2, K):                                             # K is small & static
            t_next = 2.0 * jnp.dot(t_cur.astype(lt.dtype), lt,
                                   preferred_element_type=jnp.float32) - t_prev
            t_prev, t_cur = t_cur, t_next
            acc = acc + jnp.dot(theta_ref[k], t_cur, preferred_element_type=jnp.float32)
    out_ref[...] = (acc + bias_ref[...]).astype(out_ref.dtype)


# ----------------------------------------------------------------------------------
# Streamed-L kernel: grid = (K-1 Chebyshev steps, column tiles of L^T).  Each column
# tile writes a DISJOINT lane slice of X_ref[s+1]; no accumulate RMW.  Both axes must
# stay sequential ("arbitrary"): scratch is per-core and the epilogue reads all of X.
# ----------------------------------------------------------------------------------
def _streamed_kernel(K, TC, lt_ref, x_ref, theta_ref, bias_ref, out_ref, X_ref):
    s = pl.program_id(0)            # builds T_{s+1}
    c = pl.program_id(1)            # column tile of L^T
    num_c = pl.num_programs(1)

    @pl.when(jnp.logical_and(s == 0, c == 0))
    def _():
        X_ref[0] = x_ref[...]                                             # stage T_0^T once

    lt_blk = lt_ref[...]                                                  # (N_pad, TC)
    col0 = pl.multiple_of(c * TC, TC)

    @pl.when(s == 0)                                                      # T_1 = T_0 @ L^T
    def _():
        X_ref[1, :, pl.ds(col0, TC)] = jnp.dot(
            X_ref[0].astype(lt_blk.dtype), lt_blk,
            preferred_element_type=jnp.float32)

    @pl.when(s > 0)                                                       # T_{s+1} = 2 T_s L^T - T_{s-1}
    def _():
        t_s = X_ref[s]                                                    # (C_in, N_pad)
        prev = X_ref[s - 1, :, pl.ds(col0, TC)]
        X_ref[s + 1, :, pl.ds(col0, TC)] = (
            2.0 * jnp.dot(t_s.astype(lt_blk.dtype), lt_blk,
                          preferred_element_type=jnp.float32) - prev)

    # Epilogue at the last grid step: theta contraction + bias, lane-dense (C_out, N) store.
    @pl.when(jnp.logical_and(s == K - 2, c == num_c - 1))
    def _():
        acc = jnp.dot(theta_ref[0], X_ref[0], preferred_element_type=jnp.float32)
        for k in range(1, K):
            acc = acc + jnp.dot(theta_ref[k], X_ref[k],
                                preferred_element_type=jnp.float32)
        out_ref[...] = (acc + bias_ref[...]).astype(out_ref.dtype)


# ----------------------------------------------------------------------------------
# Wrapper
# ----------------------------------------------------------------------------------
def deff_simplicial_conv(L, x, theta, bias=None, *, use_bf16_l=False, max_col_tile=None):
    """L: (N, N), x: (C_in, N), theta: (C_out, C_in, K), bias: (C_out, 1) -> (C_out, N)."""
    assert L.ndim == 2 and L.shape[0] == L.shape[1]
    C_out, C_in, K = theta.shape
    C_in_x, N = x.shape
    assert C_in_x == C_in and N == L.shape[0]

    f32 = jnp.float32
    l_dtype = jnp.bfloat16 if use_bf16_l else f32
    l_bytes = 2 if use_bf16_l else 4

    n_pad = _round_up(N, _LANE)                 # N on the lane axis everywhere
    c_out_pad = _round_up(C_out, _SUBLANE)      # C_out only needs sublane alignment now

    # ---- operands, channel-major (zero padding keeps the recurrence exact) ------------
    xp = jnp.pad(x.astype(f32), ((0, 0), (0, n_pad - N)))                       # (C_in, n_pad)
    theta_t = jnp.transpose(theta.astype(f32), (2, 0, 1))                       # (K, C_out, C_in)
    theta_p = jnp.pad(theta_t, ((0, 0), (0, c_out_pad - C_out), (0, 0)))
    if bias is None:
        bias_p = jnp.zeros((c_out_pad, 1), f32)
    else:
        bias_p = jnp.pad(bias.astype(f32).reshape(C_out, 1),
                         ((0, c_out_pad - C_out), (0, 0)))
    if K > 1:
        # One-time XLA transpose; skippable for symmetric (Hodge) Laplacians.
        lt_p = jnp.pad(L.astype(f32).T,
                       ((0, n_pad - N), (0, n_pad - N))).astype(l_dtype)        # (n_pad, n_pad)

    # ---- generation-aware VMEM budget --------------------------------------------------
    cap = _vmem_capacity_bytes()
    vmem_limit = max(min((cap // 4) * 3, cap - (16 << 20)), 32 << 20)
    fixed_bytes = (2 * (_SUBLANE * n_pad * 4                       # x (sublane/lane padded)
                        + K * c_out_pad * _LANE * 4                # theta (lane padded)
                        + c_out_pad * _LANE * 4                    # bias
                        + c_out_pad * n_pad * 4)                   # out
                   + (K + 3) * _SUBLANE * n_pad * 4                # recurrence temporaries
                   + (4 << 20))                                    # compiler slack

    flops = 2 * (K - 1) * n_pad * n_pad * C_in + 2 * K * C_in * c_out_pad * n_pad
    small_io = C_in * n_pad * 4 + K * C_in * c_out_pad * 4 + c_out_pad * 4 + c_out_pad * n_pad * 4

    resident = (K == 1) or (max_col_tile is None
                            and n_pad * n_pad * l_bytes + fixed_bytes <= vmem_limit)

    if resident:
        args = (xp, theta_p, bias_p) if K == 1 else (lt_p, xp, theta_p, bias_p)
        vmem_spec = pl.BlockSpec(memory_space=pltpu.MemorySpace.VMEM)
        bytes_accessed = small_io + (0 if K == 1 else n_pad * n_pad * l_bytes)
        out = pl.pallas_call(
            functools.partial(_resident_kernel, K),
            out_shape=jax.ShapeDtypeStruct((c_out_pad, n_pad), f32),
            in_specs=[vmem_spec] * len(args),
            out_specs=vmem_spec,
            compiler_params=pltpu.CompilerParams(vmem_limit_bytes=vmem_limit),
            cost_estimate=pl.CostEstimate(flops=flops, transcendentals=0,
                                          bytes_accessed=bytes_accessed),
        )(*args)
    else:
        scratch_bytes = K * _SUBLANE * n_pad * 4
        budget = max(vmem_limit - fixed_bytes - scratch_bytes,
                     2 * n_pad * _LANE * l_bytes)
        tc = _pick_col_tile(n_pad, budget // (2 * n_pad * l_bytes))   # double-buffered L^T stream
        if max_col_tile is not None:
            tc = min(tc, _pick_col_tile(n_pad, max(_LANE, max_col_tile)))
        c_steps = n_pad // tc

        bytes_accessed = (K - 1) * n_pad * n_pad * l_bytes + small_io
        out = pl.pallas_call(
            functools.partial(_streamed_kernel, K, tc),
            out_shape=jax.ShapeDtypeStruct((c_out_pad, n_pad), f32),
            grid=(K - 1, c_steps),
            in_specs=[
                pl.BlockSpec((n_pad, tc), lambda s, c: (0, c)),                 # streamed L^T
                pl.BlockSpec((C_in, n_pad), lambda s, c: (0, 0)),
                pl.BlockSpec((K, c_out_pad, C_in), lambda s, c: (0, 0, 0)),
                pl.BlockSpec((c_out_pad, 1), lambda s, c: (0, 0)),
            ],
            out_specs=pl.BlockSpec((c_out_pad, n_pad), lambda s, c: (0, 0)),
            scratch_shapes=[pltpu.VMEM((K, C_in, n_pad), f32)],                 # T_0..T_{K-1}
            compiler_params=pltpu.CompilerParams(
                dimension_semantics=("arbitrary", "arbitrary"),   # recurrence & scratch are sequential
                vmem_limit_bytes=vmem_limit),
            cost_estimate=pl.CostEstimate(flops=flops, transcendentals=0,
                                          bytes_accessed=bytes_accessed),
        )(lt_p, xp, theta_p, bias_p)

    return out[:C_out, :N]                                     # already (C_out, N): no transpose


def _reference(L, x, theta, bias):
    """Pure-JAX replica of the PyTorch forward for verification."""
    C_out, C_in, K = theta.shape
    terms = [x]                                   # each (C_in, N)
    if K > 1:
        terms.append(x @ L.T)
        for _ in range(2, K):
            terms.append(2.0 * (terms[-1] @ L.T) - terms[-2])
    X = jnp.stack(terms, axis=-1)                 # (C_in, N, K)
    return jnp.einsum("imk,oik->om", X, theta) + bias


if __name__ == "__main__":
    # filter_size K=3, C_in=4, C_out=8, num_simplices N=256, variance=1.0
    K, C_in, C_out, N = 3, 4, 8, 256
    variance = 1.0

    key = jax.random.PRNGKey(0)
    k_L, k_x, k_theta = jax.random.split(key, 3)

    L = jax.random.normal(k_L, (N, N), dtype=jnp.float32) / jnp.sqrt(N)
    x = jax.random.normal(k_x, (C_in, N), dtype=jnp.float32)
    theta = variance * jax.random.normal(k_theta, (C_out, C_in, K), dtype=jnp.float32)
    bias = jnp.zeros((C_out, 1), dtype=jnp.float32)

    y_ref = _reference(L, x, theta, bias)

    # Resident-L path: grid-less, single VMEM buffer per operand.
    y = jax.block_until_ready(deff_simplicial_conv(L, x, theta, bias))
    assert y.shape == (C_out, N)
    assert jnp.allclose(y, y_ref, atol=1e-3, rtol=1e-3), "resident-L path mismatch"

    # Streamed-L path: force 128-wide column tiles of L^T (double-buffered DMA stream,
    # disjoint scratch writes, pl.when(s==0)/pl.when(s>0) recurrence branches).
    y_s = jax.block_until_ready(deff_simplicial_conv(L, x, theta, bias, max_col_tile=128))
    assert jnp.allclose(y_s, y_ref, atol=1e-3, rtol=1e-3), "streamed-L path mismatch"

    # Streamed path with bf16 L storage (f32 accumulation): norm-relative check.
    y_b = jax.block_until_ready(
        deff_simplicial_conv(L, x, theta, bias, max_col_tile=128, use_bf16_l=True))
    rel = float(jnp.linalg.norm(y_b - y_ref) / jnp.linalg.norm(y_ref))
    assert rel < 3e-2, f"bf16-L streamed path mismatch (rel={rel})"

    # Degenerate filter_size == 1 path (no recurrence, no L traffic).
    theta1 = theta[:, :, :1]
    y1 = jax.block_until_ready(deff_simplicial_conv(L, x, theta1, bias))
    assert jnp.allclose(y1, _reference(L, x, theta1, bias), atol=1e-3, rtol=1e-3), "K==1 mismatch"

    # Non-lane-aligned N exercises the zero-padding path.
    N2 = 200
    L2, x2 = L[:N2, :N2], x[:, :N2]
    y2 = jax.block_until_ready(deff_simplicial_conv(L2, x2, theta, bias))
    assert jnp.allclose(y2, _reference(L2, x2, theta, bias), atol=1e-3, rtol=1e-3), "padded-N mismatch"

    print("KERNEL_OK")
</pallas_src>

<mosaic_0001>
module attributes {stable_mosaic.version = 11 : i64} {
  func.func @_resident_kernel(%arg0: memref<256x256xf32, #tpu.memory_space<vmem>>, %arg1: memref<4x256xf32, #tpu.memory_space<vmem>>, %arg2: memref<3x8x4xf32, #tpu.memory_space<vmem>>, %arg3: memref<8x1xf32, #tpu.memory_space<vmem>>, %arg4: memref<8x256xf32, #tpu.memory_space<vmem>>) attributes {dimension_semantics = [], scalar_prefetch = 0 : i64, scratch_operands = 0 : i64, tpu.core_type = #tpu.core_type<tc>} {
    %c0 = arith.constant 0 : index
    %c0_0 = arith.constant 0 : index
    %0 = vector.load %arg1[%c0, %c0_0] : memref<4x256xf32, #tpu.memory_space<vmem>>, vector<4x256xf32>
    %c0_1 = arith.constant 0 : index
    %c0_2 = arith.constant 0 : index
    %c0_3 = arith.constant 0 : index
    %1 = vector.load %arg2[%c0_1, %c0_2, %c0_3] : memref<3x8x4xf32, #tpu.memory_space<vmem>>, vector<1x8x4xf32>
    %2 = vector.shape_cast %1 : vector<1x8x4xf32> to vector<8x4xf32>
    %cst = arith.constant dense<0.000000e+00> : vector<8x256xf32>
    %3 = tpu.matmul %2, %0, %cst {dimension_numbers = #tpu.dot_dimension_numbers<[1], [0], [0], [1], [0, 0, 1, 1], [], []>} : vector<8x4xf32>, vector<4x256xf32>, vector<8x256xf32> -> vector<8x256xf32>
    %c0_4 = arith.constant 0 : index
    %c0_5 = arith.constant 0 : index
    %4 = vector.load %arg0[%c0_4, %c0_5] : memref<256x256xf32, #tpu.memory_space<vmem>>, vector<256x256xf32>
    %cst_6 = arith.constant dense<0.000000e+00> : vector<4x256xf32>
    %5 = tpu.matmul %0, %4, %cst_6 {dimension_numbers = #tpu.dot_dimension_numbers<[1], [0], [0], [1], [0, 0, 1, 1], [], []>} : vector<4x256xf32>, vector<256x256xf32>, vector<4x256xf32> -> vector<4x256xf32>
    %c1 = arith.constant 1 : index
    %c0_7 = arith.constant 0 : index
    %c0_8 = arith.constant 0 : index
    %6 = vector.load %arg2[%c1, %c0_7, %c0_8] : memref<3x8x4xf32, #tpu.memory_space<vmem>>, vector<1x8x4xf32>
    %7 = vector.shape_cast %6 : vector<1x8x4xf32> to vector<8x4xf32>
    %cst_9 = arith.constant dense<0.000000e+00> : vector<8x256xf32>
    %8 = tpu.matmul %7, %5, %cst_9 {dimension_numbers = #tpu.dot_dimension_numbers<[1], [0], [0], [1], [0, 0, 1, 1], [], []>} : vector<8x4xf32>, vector<4x256xf32>, vector<8x256xf32> -> vector<8x256xf32>
    %9 = arith.addf %3, %8 : vector<8x256xf32>
    %cst_10 = arith.constant dense<0.000000e+00> : vector<4x256xf32>
    %10 = tpu.matmul %5, %4, %cst_10 {dimension_numbers = #tpu.dot_dimension_numbers<[1], [0], [0], [1], [0, 0, 1, 1], [], []>} : vector<4x256xf32>, vector<256x256xf32>, vector<4x256xf32> -> vector<4x256xf32>
    %cst_11 = arith.constant 2.000000e+00 : f32
    %11 = vector.broadcast %cst_11 : f32 to vector<4x256xf32>
    %12 = arith.mulf %11, %10 : vector<4x256xf32>
    %13 = arith.subf %12, %0 : vector<4x256xf32>
    %c2 = arith.constant 2 : index
    %c0_12 = arith.constant 0 : index
    %c0_13 = arith.constant 0 : index
    %14 = vector.load %arg2[%c2, %c0_12, %c0_13] : memref<3x8x4xf32, #tpu.memory_space<vmem>>, vector<1x8x4xf32>
    %15 = vector.shape_cast %14 : vector<1x8x4xf32> to vector<8x4xf32>
    %cst_14 = arith.constant dense<0.000000e+00> : vector<8x256xf32>
    %16 = tpu.matmul %15, %13, %cst_14 {dimension_numbers = #tpu.dot_dimension_numbers<[1], [0], [0], [1], [0, 0, 1, 1], [], []>} : vector<8x4xf32>, vector<4x256xf32>, vector<8x256xf32> -> vector<8x256xf32>
    %17 = arith.addf %9, %16 : vector<8x256xf32>
    %c0_15 = arith.constant 0 : index
    %c0_16 = arith.constant 0 : index
    %18 = vector.load %arg3[%c0_15, %c0_16] : memref<8x1xf32, #tpu.memory_space<vmem>>, vector<8x1xf32>
    %19 = vector.broadcast %18 : vector<8x1xf32> to vector<8x256xf32>
    %20 = arith.addf %17, %19 : vector<8x256xf32>
    %c0_17 = arith.constant 0 : index
    %c0_18 = arith.constant 0 : index
    %21 = vector.load %arg4[%c0_17, %c0_18] : memref<8x256xf32, #tpu.memory_space<vmem>>, vector<8x256xf32>
    tpu.vector_store %arg4[%c0_17, %c0_18], %20 {strides = array<i32>} : memref<8x256xf32, #tpu.memory_space<vmem>>, vector<8x256xf32>,
    return
  }
}

</mosaic_0001>

<bundles_post_ra>
// kernel: tpu_custom_call.1
= control target key start
LH: loop header
LB: loop body
LE: loop exit
PB: predicated region body
PF: predicated region fallthrough
CT: control target
= control target key end

     0   :  { %9 = vsyncpa [#allocation3], 0  ;;  %s887_s0 = inlined_call_operand.hbm [shape: f32[256,256], index: 0, kind: input, shape index: {}]   ;;  %s888_s1 = inlined_call_operand.vmem [shape: f32[4,256], index: 1, kind: input, shape index: {}]   ;;  %s889_s2 = inlined_call_operand.vmem [shape: f32[3,8,4], index: 2, kind: input, shape index: {}]   ;;  %s890_s3 = inlined_call_operand.vmem [shape: f32[8,1], index: 3, kind: input, shape index: {}]   ;;  %s891_s4 = inlined_call_operand.hbm [shape: f32[8,256], index: 4, kind: output, shape index: {}]  }
   0x1   :  { %10 = vsyncpa [#allocation4], 0  ;;  %s717_s15 = smov [#allocation2]   ;;  %s669_s19 = scalar_lea.hbm %s887_s0, 8192 }
   0x2   :  { %s16_s16 = sshll.u32 %s717_s15, 4  ;;  %p670_p0 = scmp.ne.s32.totalorder %s887_s0, %s669_s19  ;;  %s17_s16 = int_to_ptr.vmem [resolvable:$true] %s16_s16 }
   0x3   :  { %p673_p1 = scmp.lt.u32.totalorder %s669_s19, %s887_s0 }
   0x5   :  { %p675_p2 = pnand %p673_p1, %p670_p0 }
   0x7   :  { %678 = shalt.err (!%p675_p2)
}
   0x8   :  { %s679_s24 = scalar_lea.vmem %s17_s16, 8192  ;;  %p684_p4 = scmp.lt.s32.totalorder %s17_s16, %s17_s16 }
   0x9   :  { %p680_p3 = scmp.ne.s32.totalorder %s17_s16, %s679_s24  ;;  %p685_p5 = scmp.lt.s32.totalorder %s679_s24, %s679_s24 }
   0xb   :  { %p686_p6 = por %p685_p5, %p684_p4 }
   0xd   :  { %p687_p7 = pnand %p686_p6, %p680_p3 }
   0xf   :  { %690 = shalt.err (!%p687_p7)
}
  0x10   :  { %s718_s25 = smov 256   ;;  %s719_s26 = smov 16  }
  0x11   :  { %22 = dma.hbm_to_vmem [thread:$0]  %s887_s0, 8192, %s17_s16, [#allocation3], %s718_s25, %s718_s25, %s719_s26  }
  0x12   :  { %713 = dma.done.wait [#allocation3], 8192  }
  0x13   :  { %714 = vsyncadd [#allocation3], 4294959104  ;;  %v720_v0 = vmov 0.0   ;;  %v35_v1 = vld [vmem:[#allocation2 + $0x8] sm:$0xff]  ;;  %v37_v2 = vld [vmem:[#allocation2 + $0x18] sm:$0xff]  ;;  %vm178_vm0 = vcmask 1043456  }
  0x14   :  { %327 = vmatprep.mubr.f32.mxu1 %v720_v0  ;;  %v34_v3 = vld [vmem:[#allocation2] sm:$0xff]  ;;  %v761_v4 = vpack.c.bf16 %v37_v2, %v35_v1  ;;  %v36_v5 = vld [vmem:[#allocation2 + $0x10] sm:$0xff]  ;;  %v39_v6 = vld [vmem:[#allocation2 + $0x28] sm:$0xff]  ;;  %vm174_vm1 = vcmask 31744  }
  0x15   :  { %v41_v7 = vld [vmem:[#allocation2 + $0x38] sm:$0xff]  ;;  %v763_v8 = vpack.c.bf16 %v36_v5, %v34_v3  ;;  %v38_v10 = vld [vmem:[#allocation2 + $0x20] sm:$0xff]  ;;  %v40_v11 = vld [vmem:[#allocation2 + $0x30] sm:$0xff] }
  0x16   :  { %v765_v9 = vpack.c.bf16 %v41_v7, %v39_v6  ;;  %v43_v12 = vld [vmem:[#allocation2 + $0x48] sm:$0xff]  ;;  %530 = vmatprep.subr.bf16.mxu0 %v761_v4  ;;  %v45_v13 = vld [vmem:[#allocation2 + $0x58] sm:$0xff]  ;;  %v769_v14 = vpack.c.bf16 %v40_v11, %v38_v10  ;;  %v42_v16 = vld [vmem:[#allocation2 + $0x40] sm:$0xff] }
  0x17   :  { %532 = vmatpush1.bf16.msra.mxu0 %v763_v8  ;;  %v772_v15 = vpack.c.bf16 %v45_v13, %v43_v12  ;;  %v44_v17 = vld [vmem:[#allocation2 + $0x50] sm:$0xff]  ;;  %v47_v18 = vld [vmem:[#allocation2 + $0x68] sm:$0xff]  ;;  %v49_v19 = vld [vmem:[#allocation2 + $0x78] sm:$0xff] }
  0x18   :  { %534 = vmatprep.subr.bf16.mxu0 %v765_v9  ;;  %v775_v20 = vpack.c.bf16 %v44_v17, %v42_v16  ;;  %v778_v21 = vpack.c.bf16 %v49_v19, %v47_v18  ;;  %v46_v22 = vld [vmem:[#allocation2 + $0x60] sm:$0xff]  ;;  %v48_v23 = vld [vmem:[#allocation2 + $0x70] sm:$0xff]  ;;  %v51_v24 = vld [vmem:[#allocation2 + $0x88] sm:$0xff] }
  0x19   :  { %v53_v25 = vld [vmem:[#allocation2 + $0x98] sm:$0xff]  ;;  %v781_v26 = vpack.c.bf16 %v48_v23, %v46_v22  ;;  %v50_v28 = vld [vmem:[#allocation2 + $0x80] sm:$0xff]  ;;  %v52_v29 = vld [vmem:[#allocation2 + $0x90] sm:$0xff] }
  0x1a   :  { %v784_v27 = vpack.c.bf16 %v53_v25, %v51_v24  ;;  %v55_v30 = vld [vmem:[#allocation2 + $0xa8] sm:$0xff]  ;;  %v57_v31 = vld [vmem:[#allocation2 + $0xb8] sm:$0xff]  ;;  %v787_v32 = vpack.c.bf16 %v52_v29, %v50_v28  ;;  %v54_v34 = vld [vmem:[#allocation2 + $0xa0] sm:$0xff] }
  0x1b   :  { %536 = vmatpush1.bf16.msra.mxu0 %v769_v14  ;;  %v790_v33 = vpack.c.bf16 %v57_v31, %v55_v30  ;;  %v56_v35 = vld [vmem:[#allocation2 + $0xb0] sm:$0xff]  ;;  %v59_v36 = vld [vmem:[#allocation2 + $0xc8] sm:$0xff]  ;;  %v61_v37 = vld [vmem:[#allocation2 + $0xd8] sm:$0xff] }
  0x1c   :  { %538 = vmatprep.subr.bf16.mxu0 %v772_v15  ;;  %v793_v38 = vpack.c.bf16 %v56_v35, %v54_v34  ;;  %v796_v39 = vpack.c.bf16 %v61_v37, %v59_v36  ;;  %v58_v40 = vld [vmem:[#allocation2 + $0xc0] sm:$0xff]  ;;  %v60_v41 = vld [vmem:[#allocation2 + $0xd0] sm:$0xff]  ;;  %v63_v43 = vld [vmem:[#allocation2 + $0xe8] sm:$0xff] }
  0x1d   :  { %v801_v42 = vld [vmem:[%s888_s1] sm:$0xff]  ;;  %v65_v44 = vld [vmem:[#allocation2 + $0xf8] sm:$0xff]  ;;  %v808_v46 = vpack.c.bf16 %v60_v41, %v58_v40  ;;  %v64_v50 = vld [vmem:[#allocation2 + $0xf0] sm:$0xff]  ;;  %v721_v41 = vmov 0  }
  0x1e   :  { %v805_v45 = vcombine.high %v801_v42, %v801_v42  ;;  %v33_v47 = vld [vmem:[%s889_s2] sm:$0xff]  ;;  %v815_v48 = vpack.c.bf16 %v65_v44, %v63_v43  ;;  %v67_v51 = vld [vmem:[#allocation2 + $0x108] sm:$0xff]  ;;  %v69_v52 = vld [vmem:[#allocation2 + $0x118] sm:$0xff]  ;;  %667 = vset.pattern.permute.xlu0 %v721_v41 }
  0x1f   :  { %540 = vmatpush1.bf16.msra.mxu0 %v775_v20  ;;  %v62_v49 = vld [vmem:[#allocation2 + $0xe0] sm:$0xff]  ;;  %v828_v54 = vpack.c.bf16 %v69_v52, %v67_v51  ;;  %v68_v56 = vld [vmem:[#allocation2 + $0x110] sm:$0xff]  ;;  %v71_v57 = vld [vmem:[#allocation2 + $0x128] sm:$0xff] }
  0x20   :  { %542 = vmatprep.subr.bf16.mxu0 %v778_v21  ;;  %165 = vmatprep.mubr.f32.mxu0 %v805_v45  ;;  %v824_v53 = vpack.c.bf16 %v64_v50, %v62_v49  ;;  %v66_v55 = vld [vmem:[#allocation2 + $0x100] sm:$0xff]  ;;  %v73_v58 = vld [vmem:[#allocation2 + $0x138] sm:$0xff]  ;;  %v72_v62 = vld [vmem:[#allocation2 + $0x130] sm:$0xff] }
  0x21   :  { %522 = vmatprep.subr.msk.mxu1 %vm178_vm0, %v805_v45  ;;  %v832_v59 = vpack.c.bf16 %v68_v56, %v66_v55  ;;  %v836_v60 = vpack.c.bf16 %v73_v58, %v71_v57  ;;  %v70_v61 = vld [vmem:[#allocation2 + $0x120] sm:$0xff]  ;;  %v75_v63 = vld [vmem:[#allocation2 + $0x148] sm:$0xff]  ;;  %v77_v1 = vld [vmem:[#allocation2 + $0x158] sm:$0xff] }
  0x22   :  { %523 = vmatpush1.msk.msra.mxu1 %vm178_vm0, %v801_v42  ;;  %v567_v2 = vpack.c.bf16 %v72_v62, %v70_v61  ;;  %v569_v3 = vpack.c.bf16 %v77_v1, %v75_v63  ;;  %v76_v5 = vld [vmem:[#allocation2 + $0x150] sm:$0xff]  ;;  %v79_v6 = vld [vmem:[#allocation2 + $0x168] sm:$0xff]  ;;  %v81_v7 = vld [vmem:[#allocation2 + $0x178] sm:$0xff] }
  0x23   :  { %544 = vmatpush1.bf16.msra.mxu0 %v781_v26  ;;  %594 = vmatprep.subr.bf16.mxu1 %v761_v4  ;;  %v74_v4 = vld [vmem:[#allocation2 + $0x140] sm:$0xff]  ;;  %v80_v11 = vld [vmem:[#allocation2 + $0x170] sm:$0xff]  ;;  %v83_v12 = vld [vmem:[#allocation2 + $0x188] sm:$0xff] }
  0x24   :  { %546 = vmatprep.subr.bf16.mxu0 %v784_v27  ;;  %524 = vmatmul.mubr.msk.f32.vlgmr.msra.gmra.mrb[0].mxu1 %vm174_vm1, %v33_v47  ;;  %v78_v10 = vld [vmem:[#allocation2 + $0x160] sm:$0xff]  ;;  %v85_v13 = vld [vmem:[#allocation2 + $0x198] sm:$0xff]  ;;  %v84_v17 = vld [vmem:[#allocation2 + $0x190] sm:$0xff] }
  0x25   :  { %596 = vmatpush1.bf16.msra.mxu1 %v763_v8  ;;  %v571_v8 = vpack.c.bf16 %v76_v5, %v74_v4  ;;  %v82_v16 = vld [vmem:[#allocation2 + $0x180] sm:$0xff]  ;;  %v87_v18 = vld [vmem:[#allocation2 + $0x1a8] sm:$0xff]  ;;  %v89_v19 = vld [vmem:[#allocation2 + $0x1b8] sm:$0xff] }
  0x26   :  { %598 = vmatprep.subr.bf16.mxu1 %v765_v9  ;;  %v573_v9 = vpack.c.bf16 %v81_v7, %v79_v6  ;;  %v86_v22 = vld [vmem:[#allocation2 + $0x1a0] sm:$0xff]  ;;  %v88_v23 = vld [vmem:[#allocation2 + $0x1b0] sm:$0xff]  ;;  %v91_v24 = vld [vmem:[#allocation2 + $0x1c8] sm:$0xff] }
  0x27   :  { %548 = vmatpush1.bf16.msra.mxu0 %v787_v32  ;;  %v93_v25 = vld [vmem:[#allocation2 + $0x1d8] sm:$0xff]  ;;  %v90_v28 = vld [vmem:[#allocation2 + $0x1c0] sm:$0xff]  ;;  %v92_v29 = vld [vmem:[#allocation2 + $0x1d0] sm:$0xff] }
  0x28   :  { %550 = vmatprep.subr.bf16.mxu0 %v790_v33  ;;  %v95_v30 = vld [vmem:[#allocation2 + $0x1e8] sm:$0xff]  ;;  %v97_v31 = vld [vmem:[#allocation2 + $0x1f8] sm:$0xff]  ;;  %v94_v34 = vld [vmem:[#allocation2 + $0x1e0] sm:$0xff] }
  0x29   :  { %600 = vmatpush1.bf16.msra.mxu1 %v769_v14  ;;  %v575_v14 = vpack.c.bf16 %v80_v11, %v78_v10  ;;  %v96_v35 = vld [vmem:[#allocation2 + $0x1f0] sm:$0xff]  ;;  %v493_v40 = vld [vmem:[%s890_s3] sm:$0xff]  ;;  %s722_s3 = smov [#allocation5]  }
  0x2a   :  { %602 = vmatprep.subr.bf16.mxu1 %v772_v15  ;;  %v577_v15 = vpack.c.bf16 %v85_v13, %v83_v12  ;;  %v591_v36 = vpack.c.bf16 %v96_v35, %v94_v34  ;;  %496 = vperm.xlu0 %667, %v493_v40   ;;  %v525_v49 = vld [vmem:[%s889_s2 + $0x10] sm:$0xff]  ;;  %s509_s11 = sshll.u32 %s722_s3, 4  ;;  %s510_s11 = int_to_ptr.vmem [resolvable:$true] %s509_s11 }
  0x2b   :  { %552 = vmatpush1.bf16.msra.mxu0 %v793_v38  ;;  %p696_p9 = scmp.lt.s32.totalorder %s510_s11, %s510_s11 }
  0x2c   :  { %554 = vmatprep.subr.bf16.mxu0 %v796_v39 }
  0x2d   :  { %604 = vmatpush1.bf16.msra.mxu1 %v775_v20  ;;  %v579_v20 = vpack.c.bf16 %v84_v17, %v82_v16 }
  0x2e   :  { %606 = vmatprep.subr.bf16.mxu1 %v778_v21  ;;  %v581_v21 = vpack.c.bf16 %v89_v19, %v87_v18 }
  0x2f   :  { %556 = vmatpush1.bf16.msra.mxu0 %v808_v46 }
  0x30   :  { %558 = vmatprep.subr.bf16.mxu0 %v815_v48 }
  0x31   :  { %608 = vmatpush1.bf16.msra.mxu1 %v781_v26  ;;  %v583_v26 = vpack.c.bf16 %v88_v23, %v86_v22 }
  0x32   :  { %610 = vmatprep.subr.bf16.mxu1 %v784_v27  ;;  %v585_v27 = vpack.c.bf16 %v93_v25, %v91_v24 }
  0x33   :  { %560 = vmatpush1.bf16.msra.mxu0 %v824_v53 }
  0x34   :  { %562 = vmatprep.subr.bf16.mxu0 %v828_v54 }
  0x35   :  { %612 = vmatpush1.bf16.msra.mxu1 %v787_v32  ;;  %v587_v32 = vpack.c.bf16 %v92_v29, %v90_v28 }
  0x36   :  { %614 = vmatprep.subr.bf16.mxu1 %v790_v33  ;;  %v589_v33 = vpack.c.bf16 %v97_v31, %v95_v30 }
  0x37   :  { %564 = vmatpush1.bf16.msra.mxu0 %v832_v59 }
  0x38   :  { %566 = vmatprep.subr.bf16.mxu0 %v836_v60 }
  0x39   :  { %616 = vmatpush1.bf16.msra.mxu1 %v793_v38 }
  0x3a   :  { %618 = vmatprep.subr.bf16.mxu1 %v796_v39  ;;  %v518_v39 = vld [vmem:[%s889_s2 + $0x8] sm:$0xff]  ;;  %s691_s2 = scalar_lea.vmem %s510_s11, 256 }
  0x3b   :  { %568 = vmatpush1.bf16.msra.mxu0 %v567_v2  ;;  %p692_p8 = scmp.ne.s32.totalorder %s510_s11, %s691_s2  ;;  %p697_p10 = scmp.lt.s32.totalorder %s691_s2, %s691_s2 }
  0x3c   :  { %570 = vmatprep.subr.bf16.mxu0 %v569_v3 }
  0x3d   :  { %620 = vmatpush1.bf16.msra.mxu1 %v808_v46  ;;  %p698_p11 = por %p697_p10, %p696_p9 }
  0x3e   :  { %622 = vmatprep.subr.bf16.mxu1 %v815_v48 }
  0x3f   :  { %572 = vmatpush1.bf16.msra.mxu0 %v571_v8  ;;  %p699_p12 = pnand %p698_p11, %p692_p8 }
  0x40   :  { %574 = vmatprep.subr.bf16.mxu0 %v573_v9 }
  0x41   :  { %624 = vmatpush1.bf16.msra.mxu1 %v824_v53 }
  0x42   :  { %626 = vmatprep.subr.bf16.mxu1 %v828_v54 }
  0x43   :  { %576 = vmatpush1.bf16.msra.mxu0 %v575_v14 }
  0x44   :  { %578 = vmatprep.subr.bf16.mxu0 %v577_v15 }
  0x45   :  { %628 = vmatpush1.bf16.msra.mxu1 %v832_v59 }
  0x46   :  { %630 = vmatprep.subr.bf16.mxu1 %v836_v60 }
  0x47   :  { %580 = vmatpush1.bf16.msra.mxu0 %v579_v20 }
  0x48   :  { %582 = vmatprep.subr.bf16.mxu0 %v581_v21 }
  0x49   :  { %632 = vmatpush1.bf16.msra.mxu1 %v567_v2 }
  0x4a   :  { %634 = vmatprep.subr.bf16.mxu1 %v569_v3 }
  0x4b   :  { %584 = vmatpush1.bf16.msra.mxu0 %v583_v26 }
  0x4c   :  { %586 = vmatprep.subr.bf16.mxu0 %v585_v27 }
  0x4d   :  { %636 = vmatpush1.bf16.msra.mxu1 %v571_v8 }
  0x4e   :  { %638 = vmatprep.subr.bf16.mxu1 %v573_v9 }
  0x4f   :  { %588 = vmatpush1.bf16.msra.mxu0 %v587_v32 }
  0x50   :  { %590 = vmatprep.subr.bf16.mxu0 %v589_v33 }
  0x51   :  { %640 = vmatpush1.bf16.msra.mxu1 %v575_v14 }
  0x52   :  { %642 = vmatprep.subr.bf16.mxu1 %v577_v15 }
  0x53   :  { %592 = vmatpush1.bf16.msra.mxu0 %v591_v36 }
  0x55   :  { %644 = vmatpush1.bf16.msra.mxu1 %v579_v20 }
  0x56   :  { %166 = vmatmul.mubr.f32.vlgmr.msra.gmra.mrb[0].mxu0 %v801_v42  ;;  %646 = vmatprep.subr.bf16.mxu1 %v581_v21 }
  0x57   :  { %249 = vmatprep.mubr.f32.mxu0 %v720_v0 }
  0x59   :  { %648 = vmatpush1.bf16.msra.mxu1 %v583_v26 }
  0x5a   :  { %650 = vmatprep.subr.bf16.mxu1 %v585_v27 }
  0x5d   :  { %652 = vmatpush1.bf16.msra.mxu1 %v587_v32 }
  0x5e   :  { %654 = vmatprep.subr.bf16.mxu1 %v589_v33 }
  0x61   :  { %656 = vmatpush1.bf16.msra.mxu1 %v591_v36 }
  0xa9   :  { %v497_v53 = vpop.permute.xlu0 %496 }
 0x129   :  { %v167_v37 = vpop.f32.mrb[0].mxu0 }
 0x12a   :  { %v169_v38 = vpop.f32.mrb[1].mxu0 }
 0x12b   :  { %519 = vmatprep.subr.msk.mxu0 %vm178_vm0, %v169_v38  ;;  %398 = vmatprep.mubr.f32.mxu1 %v169_v38 }
 0x12c   :  { %520 = vmatpush1.msk.msra.mxu0 %vm178_vm0, %v167_v37  ;;  %399 = vmatmul.mubr.f32.vlgmr.msra.gmra.mrb[2].mxu1 %v167_v37 }
 0x12d   :  { %484 = vmatprep.mubr.f32.mxu1 %v720_v0  ;;  %521 = vmatmul.mubr.msk.f32.vlgmr.msra.gmra.mrb[2].mxu0 %vm174_vm1, %v518_v39 }
 0x1ff   :  { %v400_v43 = vpop.f32.mrb[2].mxu1 }
 0x200   :  { %v405_v44 = vmul.f32 2.0, %v400_v43  ;;  %v402_v46 = vpop.f32.mrb[3].mxu1  ;;  %v251_v50 = vpop.f32.mrb[2].mxu0 }
 0x201   :  { %v406_v47 = vmul.f32 2.0, %v402_v46  ;;  %v253_v51 = vpop.f32.mrb[3].mxu0 }
 0x202   :  { %v407_v0 = vsub.f32 %v405_v44, %v801_v42 }
 0x203   :  { %v408_v48 = vsub.f32 %v406_v47, %v805_v45 }
 0x205   :  { %526 = vmatprep.subr.msk.mxu1 %vm178_vm0, %v408_v48 }
 0x206   :  { %527 = vmatpush1.msk.msra.mxu1 %vm178_vm0, %v407_v0 }
 0x207   :  { %528 = vmatmul.mubr.msk.f32.vlgmr.msra.gmra.mrb[0].mxu1 %vm174_vm1, %v525_v49 }
 0x2da   :  { %v486_v52 = vpop.f32.mrb[0].mxu1 }
 0x2db   :  { %v657_v54 = vadd.f32 %v486_v52, %v251_v50  ;;  %v488_v55 = vpop.f32.mrb[1].mxu1 }
 0x2dc   :  { %v658_v45 = vadd.f32 %v488_v55, %v253_v51 }
 0x2dd   :  { %v499_v42 = vadd.f32 %v657_v54, %v497_v53 }
 0x2de   :  { %v500_v56 = vadd.f32 %v658_v45, %v497_v53 }
 0x2df   :  { %501 = vst [vmem:[#allocation5] sm:$0xff] %v499_v42 }
 0x2e0   :  { %502 = vst [vmem:[#allocation5 + $0x8] sm:$0xff] %v500_v56 }
 0x2e1   :  { %702 = shalt.err (!%p699_p12)
}
 0x2e2   :  { %s703_s14 = scalar_lea.hbm %s891_s4, 256 }
 0x2e3   :  { %p704_p13 = scmp.ne.s32.totalorder %s891_s4, %s703_s14  ;;  %p707_p0 = scmp.lt.u32.totalorder %s703_s14, %s891_s4 }
 0x2e5   :  { %p709_p1 = pnand %p707_p0, %p704_p13 }
 0x2e7   :  { %712 = shalt.err (!%p709_p1)
}
 0x2e8   :  { %512 = dma.vmem_to_hbm [thread:$0]  %s510_s11, 256, %s891_s4, [#allocation4]  }
 0x2e9   :  { %715 = dma.done.wait [#allocation4], 256  }
 0x2ea   :  { %716 = vsyncadd [#allocation4], 4294967040 }
 0x2eb   :  { %516 = vsyncpa [#allocation3], 1 }
 0x2ec   :  { %517 = vsyncpa [#allocation4], 1 }

</bundles_post_ra>
